<compile_context>
chip_gen: v5e
topology: v5e:2x2
jax: 0.10.0
libtpu: 0.0.40
codegen_flags: <defaults>
</compile_context>

<pallas_src>
import functools
import math

import jax
import jax.numpy as jnp
import numpy as np
from jax import lax
from jax.experimental import pallas as pl
from jax.experimental.pallas import tpu as pltpu


_ROLL_SIGN = None


def _roll_sign():
    """Determine pltpu.roll's rotation direction once (cached, resolved outside jit).

    Returns sign s.t. pltpu.roll(x, (sign*delta) % n, axis)[p] == x[(p + delta) % n].
    """
    global _ROLL_SIGN
    if _ROLL_SIGN is None:
        def probe(x_ref, o_ref):
            o_ref[...] = pltpu.roll(x_ref[...], 1, axis=1)

        x = jnp.broadcast_to(jnp.arange(128, dtype=jnp.float32), (8, 128))
        y = pl.pallas_call(
            probe, out_shape=jax.ShapeDtypeStruct((8, 128), jnp.float32))(x)
        # jnp.roll convention: out[p] = in[(p - shift) % n]  ->  out[0] == 127 for shift=1.
        _ROLL_SIGN = -1 if int(np.asarray(y)[0, 0]) == 127 else 1
    return _ROLL_SIGN


def _res_ghost_kernel(x_ref, w1_ref, s1_ref, b1_ref, w1r_ref, s1r_ref, b1r_ref,
                      wd_ref, s2_ref, b2_ref, o_ref, *,
                      H, W, nb, cin, init_c, new_c, keep2, roll_sign):
    # x_ref : (nb, cin, HW)         input images, spatial flattened onto lanes
    # w1    : (init_c, cin)         1x1 conv weight
    # s1/b1 : (init_c, 1)           folded BN scale/bias for primary conv
    # w1r/s1r/b1r : (new_c, ...)    same, rows repeated `mult` times (channel-multiplier order)
    # wd    : (9, new_c, 1)         depthwise 3x3 weights, tap-major
    # s2/b2 : (new_c, 1)            folded BN scale/bias for cheap op
    # o_ref : (nb, oup, HW)         oup = cin + init_c + keep2
    HW = H * W

    # Per-tap edge masks (shared across images/channels), built purely from lane indices.
    lane = lax.broadcasted_iota(jnp.int32, (1, HW), 1)
    col = lane % W
    row_ok = {-1: lane >= W, 0: None, 1: lane < (H - 1) * W}
    col_ok = {-1: col >= 1, 0: None, 1: col <= W - 2}

    w1 = w1_ref[...]
    s1 = s1_ref[...]
    b1 = b1_ref[...]
    w1r = w1r_ref[...]
    s1r = s1r_ref[...]
    b1r = b1r_ref[...]
    s2 = s2_ref[...]
    b2 = b2_ref[...]
    wd = wd_ref[...]                                   # (9, new_c, 1)

    for n in range(nb):                                # static unroll over the batch sub-block
        x = x_ref[n]                                   # (cin, HW)

        # ---- primary 1x1 conv on the MXU + folded BN + ReLU ----
        y1 = jnp.dot(w1, x, preferred_element_type=jnp.float32)
        y1 = jnp.maximum(y1 * s1 + b1, 0.0)            # (init_c, HW)

        # Channel-replicated copy for the depthwise conv: output channel o = c*mult + m
        # already sits on sublane o, so no in-kernel sublane repeat/relayout is needed.
        y1r = jnp.dot(w1r, x, preferred_element_type=jnp.float32)
        y1r = jnp.maximum(y1r * s1r + b1r, 0.0)        # (new_c, HW)

        # ---- depthwise 3x3 (stride 1, pad 1) via lane rolls + edge masks ----
        acc = jnp.zeros((new_c, HW), jnp.float32)
        for kh in range(3):
            dh = kh - 1
            for kw in range(3):
                dw = kw - 1
                delta = dh * W + dw                    # want win[p] = y1r[p + delta]
                shift = (roll_sign * delta) % HW
                win = y1r if shift == 0 else pltpu.roll(y1r, shift, axis=1)
                mask = row_ok[dh]
                if col_ok[dw] is not None:
                    mask = col_ok[dw] if mask is None else jnp.logical_and(mask, col_ok[dw])
                if mask is not None:
                    win = jnp.where(mask, win, 0.0)
                acc = acc + wd[kh * 3 + kw] * win
        y2 = jnp.maximum(acc * s2 + b2, 0.0)           # (new_c, HW)

        # ---- concat([x, x1, x2], channel)[:oup] — only oup channels are written ----
        o_ref[n, :cin] = x
        o_ref[n, cin:cin + init_c] = y1
        if keep2 > 0:
            o_ref[n, cin + init_c:] = y2[:keep2]


def res_ghost_forward(x, w1, s1, b1, wd, s2, b2, oup):
    """ResGhostModule forward (stride=1).

    x : (N, Cin, H, W) f32
    w1: (init_c, Cin, 1, 1)   1x1 conv weight
    s1, b1: (init_c,)         folded eval-mode BN scale/bias (primary conv)
    wd: (new_c, 1, 3, 3)      depthwise conv weight (groups=init_c)
    s2, b2: (new_c,)          folded eval-mode BN scale/bias (cheap op)
    """
    N, cin, H, W = x.shape
    init_c = w1.shape[0]
    new_c = wd.shape[0]
    mult = new_c // init_c
    HW = H * W
    keep2 = oup - cin - init_c
    assert 0 <= keep2 <= new_c, (oup, cin, init_c, new_c)
    # NOTE: if keep2 < new_c the trailing y2 channels are still computed (cheap) but never
    # written to HBM, so there is no wasted store traffic or wrapper slice copy.

    # ---- host-side layout plumbing (cheap XLA reshapes/repeats) ----
    x_flat = x.reshape(N, cin, HW)                          # lane-dense spatial axis
    w1_2d = w1.reshape(init_c, cin).astype(jnp.float32)
    s1c = s1.reshape(init_c, 1).astype(jnp.float32)
    b1c = b1.reshape(init_c, 1).astype(jnp.float32)
    w1r = jnp.repeat(w1_2d, mult, axis=0)                   # (new_c, cin)
    s1r = jnp.repeat(s1c, mult, axis=0)
    b1r = jnp.repeat(b1c, mult, axis=0)
    wd_taps = jnp.transpose(wd.reshape(new_c, 9))[:, :, None].astype(jnp.float32)
    s2c = s2.reshape(new_c, 1).astype(jnp.float32)
    b2c = b2.reshape(new_c, 1).astype(jnp.float32)

    # ---- batch sub-block: amortize per-grid-step overhead, stay within a conservative
    #      VMEM budget (safe for v7x's smaller 64 MiB VMEM / 32 MiB scoped default) ----
    per_img_bytes = 2 * (cin + oup) * HW * 4                # in+out, double-buffered
    budget = 8 << 20
    nb = max(1, min(N, budget // max(per_img_bytes, 1)))
    while N % nb:
        nb -= 1

    kernel = functools.partial(
        _res_ghost_kernel, H=H, W=W, nb=nb, cin=cin, init_c=init_c,
        new_c=new_c, keep2=keep2, roll_sign=_roll_sign())

    out = pl.pallas_call(
        kernel,
        out_shape=jax.ShapeDtypeStruct((N, oup, HW), jnp.float32),
        grid_spec=pltpu.PrefetchScalarGridSpec(
            num_scalar_prefetch=0,
            grid=(N // nb,),
            in_specs=[
                pl.BlockSpec((nb, cin, HW), lambda n: (n, 0, 0)),
                pl.BlockSpec(w1_2d.shape, lambda n: (0, 0)),
                pl.BlockSpec(s1c.shape, lambda n: (0, 0)),
                pl.BlockSpec(b1c.shape, lambda n: (0, 0)),
                pl.BlockSpec(w1r.shape, lambda n: (0, 0)),
                pl.BlockSpec(s1r.shape, lambda n: (0, 0)),
                pl.BlockSpec(b1r.shape, lambda n: (0, 0)),
                pl.BlockSpec(wd_taps.shape, lambda n: (0, 0, 0)),
                pl.BlockSpec(s2c.shape, lambda n: (0, 0)),
                pl.BlockSpec(b2c.shape, lambda n: (0, 0)),
            ],
            out_specs=pl.BlockSpec((nb, oup, HW), lambda n: (n, 0, 0)),
        ),
        compiler_params=pltpu.CompilerParams(dimension_semantics=("parallel",)),
    )(x_flat, w1_2d, s1c, b1c, w1r, s1r, b1r, wd_taps, s2c, b2c)

    return out.reshape(N, oup, H, W)


def make_params(key, inp, oup, ratio=4, dw_size=3, eps=1e-5):
    """Mirrors ResGhostModule.__init__: GhostModule(inp, oup - inp, 1, ratio - 1, 3)."""
    assert ratio > 2
    oup_g = oup - inp
    ratio_g = ratio - 1
    init_c = math.ceil(oup_g / ratio_g)
    mult = ratio_g - 1
    new_c = init_c * mult

    # Weights (and the test input) are snapped to bf16-representable values so the numeric
    # check is insensitive to how many MXU passes the in-kernel f32 matmul uses.
    def q(v):
        return v.astype(jnp.bfloat16).astype(jnp.float32)

    k = jax.random.split(key, 6)
    w1 = q(jax.random.normal(k[0], (init_c, inp, 1, 1), jnp.float32) * 0.5)
    g1 = 1.0 + 0.1 * jax.random.normal(k[1], (init_c,), jnp.float32)
    be1 = 0.1 * jax.random.normal(k[2], (init_c,), jnp.float32)
    wd = q(jax.random.normal(k[3], (new_c, 1, dw_size, dw_size), jnp.float32) * 0.5)
    g2 = 1.0 + 0.1 * jax.random.normal(k[4], (new_c,), jnp.float32)
    be2 = 0.1 * jax.random.normal(k[5], (new_c,), jnp.float32)

    # Fold eval-mode BN (running_mean=0, running_var=1) into scale/bias.
    s1 = g1 / jnp.sqrt(1.0 + eps)
    b1 = be1
    s2 = g2 / jnp.sqrt(1.0 + eps)
    b2 = be2
    return dict(w1=w1, s1=s1, b1=b1, wd=wd, s2=s2, b2=b2)


def ref_forward(x, w1, s1, b1, wd, s2, b2, oup):
    """Pure-JAX reference of ResGhostModule.forward (stride=1, eval-mode BN)."""
    dn = ("NCHW", "OIHW", "NCHW")
    y1 = lax.conv_general_dilated(x, w1, (1, 1), "VALID", dimension_numbers=dn,
                                  precision=lax.Precision.HIGHEST)
    y1 = jnp.maximum(y1 * s1[None, :, None, None] + b1[None, :, None, None], 0.0)
    init_c = w1.shape[0]
    y2 = lax.conv_general_dilated(y1, wd, (1, 1), [(1, 1), (1, 1)],
                                  dimension_numbers=dn,
                                  feature_group_count=init_c,
                                  precision=lax.Precision.HIGHEST)
    y2 = jnp.maximum(y2 * s2[None, :, None, None] + b2[None, :, None, None], 0.0)
    out = jnp.concatenate([x, y1, y2], axis=1)
    return out[:, :oup]


if __name__ == "__main__":
    # ResGhostModule(inp=4, oup=16, kernel_size=1, ratio=4, dw_size=3, stride=1)
    inp, oup, ratio = 4, 16, 4
    N, H, W = 2, 16, 16

    key = jax.random.PRNGKey(0)
    kx, kp = jax.random.split(key)
    x = jax.random.normal(kx, (N, inp, H, W), jnp.float32)
    x = x.astype(jnp.bfloat16).astype(jnp.float32)   # bf16-representable (see make_params)
    p = make_params(kp, inp, oup, ratio=ratio)

    out = res_ghost_forward(x, p["w1"], p["s1"], p["b1"], p["wd"], p["s2"], p["b2"], oup)
    out = jax.block_until_ready(out)

    ref = ref_forward(x, p["w1"], p["s1"], p["b1"], p["wd"], p["s2"], p["b2"], oup)

    assert out.shape == (N, oup, H, W), out.shape
    np.testing.assert_allclose(np.asarray(out), np.asarray(ref), rtol=1e-3, atol=1e-3)
    print("KERNEL_OK")
</pallas_src>

<mosaic_0001>
module attributes {stable_mosaic.version = 11 : i64} {
  func.func @probe(%arg0: memref<8x128xf32, #tpu.memory_space<vmem>>, %arg1: memref<8x128xf32, #tpu.memory_space<vmem>>) attributes {dimension_semantics = [], scalar_prefetch = 0 : i64, scratch_operands = 0 : i64, tpu.core_type = #tpu.core_type<tc>} {
    %c0 = arith.constant 0 : index
    %c0_0 = arith.constant 0 : index
    %0 = vector.load %arg0[%c0, %c0_0] : memref<8x128xf32, #tpu.memory_space<vmem>>, vector<8x128xf32>
    %c1_i32 = arith.constant 1 : i32
    %1 = tpu.dynamic_rotate %0 by %c1_i32 dim 1 : vector<8x128xf32>, i32 -> vector<8x128xf32>
    %c0_1 = arith.constant 0 : index
    %c0_2 = arith.constant 0 : index
    %2 = vector.load %arg1[%c0_1, %c0_2] : memref<8x128xf32, #tpu.memory_space<vmem>>, vector<8x128xf32>
    tpu.vector_store %arg1[%c0_1, %c0_2], %1 {strides = array<i32>} : memref<8x128xf32, #tpu.memory_space<vmem>>, vector<8x128xf32>,
    return
  }
}

</mosaic_0001>

<bundles_post_ra>
// kernel: tpu_custom_call.1
= control target key start
LH: loop header
LB: loop body
LE: loop exit
PB: predicated region body
PF: predicated region fallthrough
CT: control target
= control target key end

     0   :  { %6 = vsyncpa [#allocation3], 0  ;;  %s118_s0 = inlined_call_operand.hbm [shape: f32[8,128], index: 0, kind: input, shape index: {}]   ;;  %s119_s1 = inlined_call_operand.hbm [shape: f32[8,128], index: 1, kind: output, shape index: {}]  }
   0x1   :  { %7 = vsyncpa [#allocation4], 0  ;;  %s13_s8 = sshll.u32 %s118_s0, 4  ;;  %s99_s9 = smov [#allocation2]   ;;  %s14_s8 = int_to_ptr.hbm [resolvable:$true] %s13_s8 }
   0x2   :  { %s15_s10 = sshll.u32 %s99_s9, 4  ;;  %s16_s10 = int_to_ptr.vmem [resolvable:$true] %s15_s10 }
   0x3   :  { %18 = dma.hbm_to_vmem [thread:$0]  %s14_s8, 128, %s16_s10, [#allocation3]  }
   0x4   :  { %95 = dma.done.wait [#allocation3], 128  }
   0x5   :  { %96 = vsyncadd [#allocation3], 4294967168  ;;  %v23_v0 = vld [vmem:[#allocation2] sm:$0xff]  ;;  %s100_s11 = smov 1   ;;  %s101_s12 = smov [#allocation5]  }
   0x6   :  { %24 = vrot.lane.b32.xlu0 %v23_v0, %s100_s11  ;;  %s32_s13 = sshll.u32 %s101_s12, 4  ;;  %s34_s16 = sshll.u32 %s119_s1, 4  ;;  %s33_s13 = int_to_ptr.vmem [resolvable:$true] %s32_s13  ;;  %s35_s16 = int_to_ptr.hbm [resolvable:$true] %s34_s16 }
  0x78   :  { %v25_v1 = vpop.permute.xlu0 %24 }
  0x79   :  { %26 = vst [vmem:[#allocation5] sm:$0xff] %v25_v1 }
  0x7a   :  { %37 = dma.vmem_to_hbm [thread:$0]  %s33_s13, 128, %s35_s16, [#allocation4]  }
  0x7b   :  { %97 = dma.done.wait [#allocation4], 128  }
  0x7c   :  { %98 = vsyncadd [#allocation4], 4294967168 }
  0x7d   :  { %42 = vsyncpa [#allocation3], 1 }
  0x7e   :  { %43 = vsyncpa [#allocation4], 1 }

</bundles_post_ra>
